<compile_context>
chip_gen: v6e
topology: v6e:2x2x1
jax: 0.10.0
libtpu: 0.0.40
codegen_flags: <defaults>
</compile_context>

<pallas_src>
import jax
import jax.numpy as jnp
from jax.experimental import pallas as pl
from jax.experimental.pallas import tpu as pltpu


def _soft_l1_kernel(eps_ref, x_ref, t_ref, o_ref):
    x = x_ref[...]
    eps = eps_ref[0].astype(x.dtype)           # scalar read from SMEM (free)
    r = jnp.abs(x - t_ref[...]) - eps
    # Weak-typed bounds keep bf16/f16 inputs in their original dtype.
    o_ref[...] = jnp.clip(r, 0.0, 100.0).astype(o_ref.dtype)


def _soft_l1_2d(xf, tf, eps_arr, *, target_tile_bytes):
    """Run the kernel on a (rows, lanes) slab with lanes % 128 == 0."""
    rows, lanes = xf.shape
    itemsize = jnp.dtype(xf.dtype).itemsize
    # Packed-sublane count per dtype: 8 for 32-bit, 16 for 16-bit, 32 for 8-bit.
    sublane = {1: 32, 2: 16}.get(itemsize, 8)

    tile_rows = max(
        sublane, ((target_tile_bytes // itemsize) // lanes) // sublane * sublane
    )
    slab_bytes = rows * lanes * itemsize

    if rows <= tile_rows:
        if slab_bytes <= (1 << 20) or rows < 2 * sublane:
            block_rows = rows          # tiny slab: single full-extent block
        else:
            # Mid-size slab: force ~4 blocks (>=2) so both v7x TensorCores get
            # work and the pipeline overlaps DMA with compute.
            quarter = pl.cdiv(rows, 4)
            block_rows = ((quarter + sublane - 1) // sublane) * sublane
    else:
        block_rows = tile_rows         # ~target_tile_bytes per block
    grid = (pl.cdiv(rows, block_rows),)

    return pl.pallas_call(
        _soft_l1_kernel,
        out_shape=jax.ShapeDtypeStruct((rows, lanes), xf.dtype),
        grid=grid,
        in_specs=[
            # eps scalar: whole (1,) array resident in SMEM, no blocking.
            pl.BlockSpec(memory_space=pltpu.MemorySpace.SMEM),
            pl.BlockSpec((block_rows, lanes), lambda i: (i, 0)),
            pl.BlockSpec((block_rows, lanes), lambda i: (i, 0)),
        ],
        out_specs=pl.BlockSpec((block_rows, lanes), lambda i: (i, 0)),
        compiler_params=pltpu.CompilerParams(
            # "parallel" lets v7x shard the grid across its 2 TensorCores;
            # free on single-core v5e/v6e.
            dimension_semantics=("parallel",),
            # 24 MiB of double-buffered tiles + headroom; under v7x's 64 MiB
            # physical VMEM and well under v5e/v6e's 128 MiB.
            vmem_limit_bytes=48 * 1024 * 1024,
        ),
    )(eps_arr, xf, tf)


def soft_l1(x, target, eps=0.0, *, target_tile_bytes=4 * 1024 * 1024):
    """Pallas TPU implementation of soft_L1.forward(input, target, eps)."""
    assert x.shape == target.shape and x.dtype == target.dtype
    orig_shape = x.shape
    n = x.size

    if n < 128:
        # Sub-vreg input: a kernel launch is pure overhead.
        return jnp.clip(jnp.abs(x - target) - eps, 0.0, 100.0)

    eps_arr = jnp.asarray([eps], dtype=jnp.float32)

    tail = n % 128
    bulk_n = n - tail

    # Widest lane-dense slab width (multiple of 128) that divides the bulk.
    lanes = 128
    for cand in (4096, 2048, 1024, 512, 256):
        if bulk_n % cand == 0:
            lanes = cand
            break

    xf = x.reshape(-1)
    tf = target.reshape(-1)

    if tail == 0:
        # Common case: only free reshapes around the kernel.
        out = _soft_l1_2d(
            xf.reshape(bulk_n // lanes, lanes),
            tf.reshape(bulk_n // lanes, lanes),
            eps_arr, target_tile_bytes=target_tile_bytes,
        )
        return out.reshape(orig_shape)

    # Misaligned n: kernel on the 128-aligned bulk, tiny jnp op on the <128
    # element tail (avoids padding both full inputs and slicing the output).
    bulk_out = _soft_l1_2d(
        xf[:bulk_n].reshape(bulk_n // lanes, lanes),
        tf[:bulk_n].reshape(bulk_n // lanes, lanes),
        eps_arr, target_tile_bytes=target_tile_bytes,
    )
    tail_out = jnp.clip(jnp.abs(xf[bulk_n:] - tf[bulk_n:]) - eps, 0.0, 100.0)
    return jnp.concatenate([bulk_out.reshape(-1), tail_out]).reshape(orig_shape)


if __name__ == "__main__":
    key = jax.random.PRNGKey(0)
    k1, k2 = jax.random.split(key)
    # Small NCHW-shaped inputs consistent with a typical loss on conv outputs.
    x = jax.random.normal(k1, (2, 4, 16, 16), dtype=jnp.float32)
    t = jax.random.normal(k2, (2, 4, 16, 16), dtype=jnp.float32)
    eps = 0.1

    out = soft_l1(x, t, eps)
    jax.block_until_ready(out)

    # Reference check in plain JAX (same semantics as the torch module).
    ref = jnp.clip(jnp.abs(x - t) - eps, 0.0, 100.0)
    assert out.shape == x.shape and out.dtype == x.dtype
    assert jnp.allclose(out, ref, atol=1e-6), "mismatch vs reference"

    print("KERNEL_OK")
</pallas_src>

<mosaic_0001>
module attributes {stable_mosaic.version = 11 : i64} {
  func.func @_soft_l1_kernel(%arg0: i32, %arg1: memref<1xf32, #tpu.memory_space<smem>>, %arg2: memref<1x2048xf32, #tpu.memory_space<vmem>>, %arg3: memref<1x2048xf32, #tpu.memory_space<vmem>>, %arg4: memref<1x2048xf32, #tpu.memory_space<vmem>>) attributes {dimension_semantics = [#tpu.dimension_semantics<parallel>], iteration_bounds = array<i64: 1>, scalar_prefetch = 0 : i64, scratch_operands = 0 : i64, tpu.core_type = #tpu.core_type<tc>, window_params = [{transform_indices = @transform_0, window_bounds = array<i64: 1>}, {transform_indices = @transform_1, window_bounds = array<i64: 1, 2048>}, {transform_indices = @transform_2, window_bounds = array<i64: 1, 2048>}, {transform_indices = @transform_3, window_bounds = array<i64: 1, 2048>}]} {
    %c0 = arith.constant 0 : index
    %c0_0 = arith.constant 0 : index
    %0 = vector.load %arg2[%c0, %c0_0] : memref<1x2048xf32, #tpu.memory_space<vmem>>, vector<1x2048xf32>
    %c0_1 = arith.constant 0 : index
    %1 = memref.load %arg1[%c0_1] : memref<1xf32, #tpu.memory_space<smem>>
    %c0_2 = arith.constant 0 : index
    %c0_3 = arith.constant 0 : index
    %2 = vector.load %arg3[%c0_2, %c0_3] : memref<1x2048xf32, #tpu.memory_space<vmem>>, vector<1x2048xf32>
    %3 = arith.subf %0, %2 : vector<1x2048xf32>
    %4 = math.absf %3 : vector<1x2048xf32>
    %5 = vector.broadcast %1 : f32 to vector<1x2048xf32>
    %6 = arith.subf %4, %5 : vector<1x2048xf32>
    %cst = arith.constant 0.000000e+00 : f32
    %cst_4 = arith.constant 1.000000e+02 : f32
    %7 = vector.broadcast %cst : f32 to vector<1x2048xf32>
    %8 = arith.maximumf %7, %6 : vector<1x2048xf32>
    %9 = vector.broadcast %cst_4 : f32 to vector<1x2048xf32>
    %10 = arith.minimumf %9, %8 : vector<1x2048xf32>
    %c0_5 = arith.constant 0 : index
    %c0_6 = arith.constant 0 : index
    %11 = vector.load %arg4[%c0_5, %c0_6] : memref<1x2048xf32, #tpu.memory_space<vmem>>, vector<1x2048xf32>
    tpu.vector_store %arg4[%c0_5, %c0_6], %10 {strides = array<i32>} : memref<1x2048xf32, #tpu.memory_space<vmem>>, vector<1x2048xf32>,
    return
  }
  func.func @transform_0(%arg0: i32) -> i32 {
    %c0_i32 = arith.constant 0 : i32
    %c0_i32_0 = arith.constant 0 : i32
    return %c0_i32 : i32
  }
  func.func @transform_1(%arg0: i32) -> (i32, i32) {
    %c0_i32 = arith.constant 0 : i32
    %c0_i32_0 = arith.constant 0 : i32
    return %arg0, %c0_i32 : i32, i32
  }
  func.func @transform_2(%arg0: i32) -> (i32, i32) {
    %c0_i32 = arith.constant 0 : i32
    %c0_i32_0 = arith.constant 0 : i32
    return %arg0, %c0_i32 : i32, i32
  }
  func.func @transform_3(%arg0: i32) -> (i32, i32) {
    %c0_i32 = arith.constant 0 : i32
    %c0_i32_0 = arith.constant 0 : i32
    return %arg0, %c0_i32 : i32, i32
  }
}

</mosaic_0001>

<bundles_post_ra>
// kernel: tpu_custom_call.1
= control target key start
LH: loop header
LB: loop body
LE: loop exit
PB: predicated region body
PF: predicated region fallthrough
CT: control target
= control target key end

     0   :  { %9 = vsyncpa [#allocation4], 0  ;;  %s178_s0 = inlined_call_operand.<no memory space> [shape: f32[1], index: 0, kind: input, shape index: {}]   ;;  %s179_s1 = inlined_call_operand.hbm [shape: f32[1,2048], index: 1, kind: input, shape index: {}]   ;;  %s180_s2 = inlined_call_operand.hbm [shape: f32[1,2048], index: 2, kind: input, shape index: {}]   ;;  %s181_s3 = inlined_call_operand.hbm [shape: f32[1,2048], index: 3, kind: output, shape index: {}]  }
   0x1   :  { %10 = vsyncpa [#allocation7], 0 }
   0x2   :  { %11 = vsyncpa [#allocation5], 0  ;;  %s143_s12 = smov [#allocation3]   ;;  %s144_s14 = smov [#allocation6]  }
   0x3   :  { %s20_s13 = sshll.u32 %s143_s12, 4  ;;  %s30_s15 = sshll.u32 %s144_s14, 4  ;;  %s21_s13 = int_to_ptr.vmem [resolvable:$true] %s20_s13  ;;  %s31_s15 = int_to_ptr.vmem [resolvable:$true] %s30_s15 }
   0x4   :  { %s85_s16 = scalar_lea.vmem %s21_s13, 256  ;;  %p90_p1 = scmp.lt.s32.totalorder %s21_s13, %s21_s13 }
   0x5   :  { %p86_p0 = scmp.ne.s32.totalorder %s21_s13, %s85_s16  ;;  %p91_p2 = scmp.lt.s32.totalorder %s85_s16, %s85_s16 }
   0x7   :  { %p92_p3 = por %p91_p2, %p90_p1 }
   0x9   :  { %p93_p4 = pnand %p92_p3, %p86_p0 }
   0xb   :  { %96 = shalt.err (!%p93_p4)
}
   0xc   :  { %23 = dma.hbm_to_vmem [thread:$0]  %s179_s1, 256, %s21_s13, [#allocation4]  }
   0xd   :  { %s105_s19 = scalar_lea.vmem %s31_s15, 256  ;;  %p110_p6 = scmp.lt.s32.totalorder %s31_s15, %s31_s15 }
   0xe   :  { %p106_p5 = scmp.ne.s32.totalorder %s31_s15, %s105_s19  ;;  %p111_p7 = scmp.lt.s32.totalorder %s105_s19, %s105_s19 }
  0x10   :  { %p112_p8 = por %p111_p7, %p110_p6 }
  0x12   :  { %p113_p9 = pnand %p112_p8, %p106_p5 }
  0x14   :  { %116 = shalt.err (!%p113_p9)
}
  0x15   :  { %33 = dma.hbm_to_vmem [thread:$0]  %s180_s2, 256, %s31_s15, [#allocation7]  }
  0x16   :  { %137 = dma.done.wait [#allocation4], 256  }
  0x17   :  { %138 = vsyncadd [#allocation4], 4294967040 }
  0x18   :  { %139 = dma.done.wait [#allocation7], 256  }
  0x19   :  { %140 = vsyncadd [#allocation7], 4294967040  ;;  %v40_v0 = vld [vmem:[#allocation3] sm:$0xff]  ;;  %v43_v1 = vld [vmem:[#allocation6] sm:$0xff]  ;;  %v49_v5 = vstv %s178_s0  ;;  %s145_s2 = smov [#allocation8]  }
  0x1a   :  { %v41_v2 = vld [vmem:[#allocation3 + $0x8] sm:$0xff]  ;;  %v45_v3 = vsub.f32 %v40_v0, %v43_v1  ;;  %v44_v4 = vld [vmem:[#allocation6 + $0x8] sm:$0xff]  ;;  %s64_s23 = sshll.u32 %s145_s2, 4  ;;  %s65_s23 = int_to_ptr.vmem [resolvable:$true] %s64_s23 }
  0x1b   :  { %v46_v6 = vsub.f32 %v41_v2, %v44_v4  ;;  %s117_s24 = scalar_lea.vmem %s65_s23, 256  ;;  %p122_p11 = scmp.lt.s32.totalorder %s65_s23, %s65_s23 }
  0x1c   :  { %v47_v7 = vand.u32 2147483647, %v45_v3  ;;  %p118_p10 = scmp.ne.s32.totalorder %s65_s23, %s117_s24  ;;  %p123_p12 = scmp.lt.s32.totalorder %s117_s24, %s117_s24 }
  0x1d   :  { %v48_v8 = vand.u32 2147483647, %v46_v6 }
  0x1e   :  { %v50_v9 = vsub.f32 %v47_v7, %v49_v5  ;;  %p124_p13 = por %p123_p12, %p122_p11 }
  0x1f   :  { %v51_v10 = vsub.f32 %v48_v8, %v49_v5 }
  0x20   :  { %v52_v11 = vmax.f32 %v50_v9, 0.0  ;;  %p125_p0 = pnand %p124_p13, %p118_p10 }
  0x21   :  { %v53_v12 = vmax.f32 %v51_v10, 0.0 }
  0x22   :  { %v54_v13 = vmin.f32 %v52_v11, 100.0 }
  0x23   :  { %v55_v14 = vmin.f32 %v53_v12, 100.0 }
  0x24   :  { %56 = vst [vmem:[#allocation8] sm:$0xff] %v54_v13 }
  0x25   :  { %57 = vst [vmem:[#allocation8 + $0x8] sm:$0xff] %v55_v14 }
  0x26   :  { %128 = shalt.err (!%p125_p0)
}
  0x27   :  { %67 = dma.vmem_to_hbm [thread:$0]  %s65_s23, 256, %s181_s3, [#allocation5]  }
  0x28   :  { %141 = dma.done.wait [#allocation5], 256  }
  0x29   :  { %142 = vsyncadd [#allocation5], 4294967040 }
  0x2a   :  { %71 = vsyncpa [#allocation4], 1 }
  0x2b   :  { %72 = vsyncpa [#allocation7], 1 }
  0x2c   :  { %73 = vsyncpa [#allocation5], 1 }

</bundles_post_ra>
